<compile_context>
chip_gen: v5e
topology: v5e:2x2
jax: 0.10.0
libtpu: 0.0.40
codegen_flags: <defaults>
</compile_context>

<pallas_src>
import functools

import jax
import jax.numpy as jnp
from jax.experimental import pallas as pl
from jax.experimental.pallas import tpu as pltpu

LANE = 128
ROWS = 16  # bf16 packs two rows per sublane -> 16-row tiles give clean packed vregs


def _round_up(n, m):
    return ((n + m - 1) // m) * m


def _pad2(a, rows, cols):
    return jnp.pad(a, ((0, rows - a.shape[0]), (0, cols - a.shape[1])))


def mlp_kernel(x_ref, w1_ref, b1_ref, w2_ref, b2_ref, w3_ref, b3_ref, out_ref):
    # fc1 -> (dropout: identity at eval) -> relu
    x = x_ref[...].astype(jnp.bfloat16)                 # f32 streamed from HBM, cast in-register
    h1 = jnp.dot(x, w1_ref[...], preferred_element_type=jnp.float32) + b1_ref[...]
    h1 = jnp.maximum(h1, 0.0).astype(jnp.bfloat16)      # relu in f32, cast only for next MXU op
    # fc2 -> (dropout: identity at eval) -> relu
    h2 = jnp.dot(h1, w2_ref[...], preferred_element_type=jnp.float32) + b2_ref[...]
    h2 = jnp.maximum(h2, 0.0).astype(jnp.bfloat16)
    # fc3 (logits, no activation)
    out_ref[...] = (
        jnp.dot(h2, w3_ref[...], preferred_element_type=jnp.float32) + b3_ref[...]
    ).astype(out_ref.dtype)


def prepare_params(params):
    """One-time prep: pad hidden lane dims to 128, cast matmul operands to bf16, biases to f32.

    Keeps K of w1 == input_size (x is streamed unpadded) and N of w3 == num_classes
    (output is emitted unpadded). Zero padding elsewhere is numerically exact.
    """
    in_dim, h1 = params["w1"].shape
    h2 = params["w2"].shape[1]
    nc = params["w3"].shape[1]
    h1_p = _round_up(h1, LANE)
    h2_p = _round_up(h2, LANE)
    return {
        "w1": _pad2(params["w1"], in_dim, h1_p).astype(jnp.bfloat16),
        "b1": _pad2(params["b1"], 1, h1_p).astype(jnp.float32),
        "w2": _pad2(params["w2"], h1_p, h2_p).astype(jnp.bfloat16),
        "b2": _pad2(params["b2"], 1, h2_p).astype(jnp.float32),
        "w3": _pad2(params["w3"], h2_p, nc).astype(jnp.bfloat16),
        "b3": params["b3"].astype(jnp.float32),
    }


def _choose_tb(batch, block_batch):
    """Batch tile rows: multiple of 16; >=2 grid steps for small batches (v7x has 2 TCs)."""
    block_batch = max(ROWS, _round_up(block_batch, ROWS))
    if batch > block_batch:
        return block_batch
    half = _round_up(-(-batch // 2), ROWS)   # ceil(batch/2) rounded up to 16
    full = _round_up(batch, ROWS)
    return min(half, full)


@functools.partial(jax.jit, static_argnames=("block_batch",))
def classification2_forward(x, prepared, *, block_batch=2048):
    """x: (batch, input_size) float32. prepared: output of prepare_params()."""
    w1, b1 = prepared["w1"], prepared["b1"]
    w2, b2 = prepared["w2"], prepared["b2"]
    w3, b3 = prepared["w3"], prepared["b3"]

    batch, in_dim = x.shape
    h1_p, h2_p, nc = w1.shape[1], w2.shape[1], w3.shape[1]

    tb = _choose_tb(batch, block_batch)
    batch_p = _round_up(batch, tb)
    grid = (batch_p // tb,)

    # Only the batch dim is (cheaply) padded so the grid divides evenly.
    # Padded rows compute relu(bias) garbage and are sliced off below.
    x_p = jnp.pad(x, ((0, batch_p - batch), (0, 0))) if batch_p != batch else x

    # Weights/biases: same block for every grid step -> stay resident in VMEM (no re-DMA).
    def resident(a):
        return pl.BlockSpec(a.shape, lambda i: (0,) * a.ndim)

    flops = 2 * batch_p * (in_dim * h1_p + h1_p * h2_p + h2_p * nc)
    bytes_accessed = (
        x_p.size * 4                                         # f32 input stream
        + (w1.size + w2.size + w3.size) * 2                  # bf16 resident weights
        + (b1.size + b2.size + b3.size) * 4                  # f32 biases
        + batch_p * nc * 4                                   # f32 unpadded output
    )

    out_p = pl.pallas_call(
        mlp_kernel,
        out_shape=jax.ShapeDtypeStruct((batch_p, nc), jnp.float32),
        grid=grid,
        in_specs=[
            pl.BlockSpec((tb, in_dim), lambda i: (i, 0)),    # streamed, unpadded batch tile
            resident(w1), resident(b1),
            resident(w2), resident(b2),
            resident(w3), resident(b3),
        ],
        out_specs=pl.BlockSpec((tb, nc), lambda i: (i, 0)),  # unpadded logits
        compiler_params=pltpu.CompilerParams(
            dimension_semantics=("parallel",),               # shard batch grid across TCs (v7x)
        ),
        cost_estimate=pl.CostEstimate(
            flops=flops, transcendentals=0, bytes_accessed=bytes_accessed
        ),
    )(x_p, w1, b1, w2, b2, w3, b3)

    return out_p[:batch] if batch_p != batch else out_p


def init_params(key, input_size, hidden_size1, hidden_size2, num_classes):
    """Deterministic init mimicking nn.Linear default (uniform(-1/sqrt(fan_in), +))."""
    ks = jax.random.split(key, 6)

    def linear(kw, kb, fan_in, fan_out):
        bound = 1.0 / jnp.sqrt(fan_in)
        # Stored pre-transposed: (fan_in, fan_out) so the kernel does plain row-major matmuls.
        w = jax.random.uniform(kw, (fan_in, fan_out), jnp.float32, -bound, bound)
        b = jax.random.uniform(kb, (1, fan_out), jnp.float32, -bound, bound)
        return w, b

    w1, b1 = linear(ks[0], ks[1], input_size, hidden_size1)
    w2, b2 = linear(ks[2], ks[3], hidden_size1, hidden_size2)
    w3, b3 = linear(ks[4], ks[5], hidden_size2, num_classes)
    return {"w1": w1, "b1": b1, "w2": w2, "b2": b2, "w3": w3, "b3": b3}


def _ref_f32(x, p):
    h1 = jnp.maximum(x @ p["w1"] + p["b1"], 0.0)
    h2 = jnp.maximum(h1 @ p["w2"] + p["b2"], 0.0)
    return h2 @ p["w3"] + p["b3"]


def _ref_bf16_operands(x, p):
    # Mirrors the kernel's numerics: bf16 matmul operands, f32 accumulation/bias/relu.
    f32 = jnp.float32
    xb = x.astype(jnp.bfloat16)
    h1 = jnp.maximum(
        jnp.dot(xb, p["w1"].astype(jnp.bfloat16), preferred_element_type=f32) + p["b1"], 0.0
    )
    h2 = jnp.maximum(
        jnp.dot(h1.astype(jnp.bfloat16), p["w2"].astype(jnp.bfloat16),
                preferred_element_type=f32) + p["b2"], 0.0
    )
    return jnp.dot(h2.astype(jnp.bfloat16), p["w3"].astype(jnp.bfloat16),
                   preferred_element_type=f32) + p["b3"]


if __name__ == "__main__":
    key = jax.random.PRNGKey(0)
    k_x, k_x2, k_p = jax.random.split(key, 3)

    batch = 8
    input_size = 32
    hidden_size1 = 64
    hidden_size2 = 32
    num_layers = 1  # unused by forward (kept for constructor parity)
    num_classes = 8

    params = init_params(k_p, input_size, hidden_size1, hidden_size2, num_classes)
    prepared = prepare_params(params)  # one-time pad + bf16 cast, hoisted out of the forward path

    # Case 1: small batch, single grid step (tb=16, batch padded 8->16, rows sliced off).
    x = jax.random.normal(k_x, (batch, input_size), jnp.float32)
    out = classification2_forward(x, prepared)
    jax.block_until_ready(out)
    assert out.shape == (batch, num_classes)
    assert jnp.allclose(out, _ref_bf16_operands(x, params), atol=2e-3, rtol=2e-3)
    assert jnp.allclose(out, _ref_f32(x, params), atol=6e-2, rtol=6e-2)

    # Case 2: ragged batch -> tb=16, grid=(2,) exercises the multi-step parallel path + padding.
    x2 = jax.random.normal(k_x2, (20, input_size), jnp.float32)
    out2 = classification2_forward(x2, prepared)
    jax.block_until_ready(out2)
    assert out2.shape == (20, num_classes)
    assert jnp.allclose(out2, _ref_bf16_operands(x2, params), atol=2e-3, rtol=2e-3)
    assert jnp.allclose(out2, _ref_f32(x2, params), atol=6e-2, rtol=6e-2)

    # Case 3: larger batch with a small block_batch to exercise many grid steps.
    x3 = jax.random.normal(k_x, (100, input_size), jnp.float32)
    out3 = classification2_forward(x3, prepared, block_batch=32)  # tb=32, batch_p=128, grid=(4,)
    jax.block_until_ready(out3)
    assert out3.shape == (100, num_classes)
    assert jnp.allclose(out3, _ref_bf16_operands(x3, params), atol=2e-3, rtol=2e-3)

    # TODO(synk): nn.Dropout(p=0.5) is implemented as eval-mode identity; training-mode
    # stochastic dropout (pltpu.prng_*) is intentionally not emulated here.
    print("KERNEL_OK")
</pallas_src>

<mosaic_0001>
module attributes {stable_mosaic.version = 11 : i64} {
  func.func @mlp_kernel(%arg0: i32, %arg1: memref<16x32xf32, #tpu.memory_space<vmem>>, %arg2: memref<32x128xbf16, #tpu.memory_space<vmem>>, %arg3: memref<1x128xf32, #tpu.memory_space<vmem>>, %arg4: memref<128x128xbf16, #tpu.memory_space<vmem>>, %arg5: memref<1x128xf32, #tpu.memory_space<vmem>>, %arg6: memref<128x8xbf16, #tpu.memory_space<vmem>>, %arg7: memref<1x8xf32, #tpu.memory_space<vmem>>, %arg8: memref<16x8xf32, #tpu.memory_space<vmem>>) attributes {dimension_semantics = [#tpu.dimension_semantics<parallel>], iteration_bounds = array<i64: 1>, scalar_prefetch = 0 : i64, scratch_operands = 0 : i64, tpu.core_type = #tpu.core_type<tc>, window_params = [{transform_indices = @transform_0, window_bounds = array<i64: 16, 32>}, {pipeline_mode = #tpu.pipeline_mode<synchronous>, transform_indices = @transform_1, window_bounds = array<i64: 32, 128>}, {pipeline_mode = #tpu.pipeline_mode<synchronous>, transform_indices = @transform_2, window_bounds = array<i64: 1, 128>}, {pipeline_mode = #tpu.pipeline_mode<synchronous>, transform_indices = @transform_3, window_bounds = array<i64: 128, 128>}, {pipeline_mode = #tpu.pipeline_mode<synchronous>, transform_indices = @transform_4, window_bounds = array<i64: 1, 128>}, {pipeline_mode = #tpu.pipeline_mode<synchronous>, transform_indices = @transform_5, window_bounds = array<i64: 128, 8>}, {pipeline_mode = #tpu.pipeline_mode<synchronous>, transform_indices = @transform_6, window_bounds = array<i64: 1, 8>}, {transform_indices = @transform_7, window_bounds = array<i64: 16, 8>}]} {
    %c0 = arith.constant 0 : index
    %c0_0 = arith.constant 0 : index
    %0 = vector.load %arg1[%c0, %c0_0] : memref<16x32xf32, #tpu.memory_space<vmem>>, vector<16x32xf32>
    %1 = arith.truncf %0 : vector<16x32xf32> to vector<16x32xbf16>
    %c0_1 = arith.constant 0 : index
    %c0_2 = arith.constant 0 : index
    %2 = vector.load %arg2[%c0_1, %c0_2] : memref<32x128xbf16, #tpu.memory_space<vmem>>, vector<32x128xbf16>
    %cst = arith.constant dense<0.000000e+00> : vector<16x128xf32>
    %3 = tpu.matmul %1, %2, %cst {dimension_numbers = #tpu.dot_dimension_numbers<[1], [0], [0], [1], [0, 0, 1, 1], [], []>} : vector<16x32xbf16>, vector<32x128xbf16>, vector<16x128xf32> -> vector<16x128xf32>
    %c0_3 = arith.constant 0 : index
    %c0_4 = arith.constant 0 : index
    %4 = vector.load %arg3[%c0_3, %c0_4] : memref<1x128xf32, #tpu.memory_space<vmem>>, vector<1x128xf32>
    %5 = vector.broadcast %4 : vector<1x128xf32> to vector<16x128xf32>
    %6 = arith.addf %3, %5 : vector<16x128xf32>
    %cst_5 = arith.constant 0.000000e+00 : f32
    %7 = vector.broadcast %cst_5 : f32 to vector<16x128xf32>
    %8 = arith.maximumf %6, %7 : vector<16x128xf32>
    %9 = arith.truncf %8 : vector<16x128xf32> to vector<16x128xbf16>
    %c0_6 = arith.constant 0 : index
    %c0_7 = arith.constant 0 : index
    %10 = vector.load %arg4[%c0_6, %c0_7] : memref<128x128xbf16, #tpu.memory_space<vmem>>, vector<128x128xbf16>
    %cst_8 = arith.constant dense<0.000000e+00> : vector<16x128xf32>
    %11 = tpu.matmul %9, %10, %cst_8 {dimension_numbers = #tpu.dot_dimension_numbers<[1], [0], [0], [1], [0, 0, 1, 1], [], []>} : vector<16x128xbf16>, vector<128x128xbf16>, vector<16x128xf32> -> vector<16x128xf32>
    %c0_9 = arith.constant 0 : index
    %c0_10 = arith.constant 0 : index
    %12 = vector.load %arg5[%c0_9, %c0_10] : memref<1x128xf32, #tpu.memory_space<vmem>>, vector<1x128xf32>
    %13 = vector.broadcast %12 : vector<1x128xf32> to vector<16x128xf32>
    %14 = arith.addf %11, %13 : vector<16x128xf32>
    %cst_11 = arith.constant 0.000000e+00 : f32
    %15 = vector.broadcast %cst_11 : f32 to vector<16x128xf32>
    %16 = arith.maximumf %14, %15 : vector<16x128xf32>
    %17 = arith.truncf %16 : vector<16x128xf32> to vector<16x128xbf16>
    %c0_12 = arith.constant 0 : index
    %c0_13 = arith.constant 0 : index
    %18 = vector.load %arg6[%c0_12, %c0_13] : memref<128x8xbf16, #tpu.memory_space<vmem>>, vector<128x8xbf16>
    %cst_14 = arith.constant dense<0.000000e+00> : vector<16x8xf32>
    %19 = tpu.matmul %17, %18, %cst_14 {dimension_numbers = #tpu.dot_dimension_numbers<[1], [0], [0], [1], [0, 0, 1, 1], [], []>} : vector<16x128xbf16>, vector<128x8xbf16>, vector<16x8xf32> -> vector<16x8xf32>
    %c0_15 = arith.constant 0 : index
    %c0_16 = arith.constant 0 : index
    %20 = vector.load %arg7[%c0_15, %c0_16] : memref<1x8xf32, #tpu.memory_space<vmem>>, vector<1x8xf32>
    %21 = vector.broadcast %20 : vector<1x8xf32> to vector<16x8xf32>
    %22 = arith.addf %19, %21 : vector<16x8xf32>
    %c0_17 = arith.constant 0 : index
    %c0_18 = arith.constant 0 : index
    %23 = vector.load %arg8[%c0_17, %c0_18] : memref<16x8xf32, #tpu.memory_space<vmem>>, vector<16x8xf32>
    tpu.vector_store %arg8[%c0_17, %c0_18], %22 {strides = array<i32>} : memref<16x8xf32, #tpu.memory_space<vmem>>, vector<16x8xf32>,
    return
  }
  func.func @transform_0(%arg0: i32) -> (i32, i32) {
    %c0_i32 = arith.constant 0 : i32
    %c0_i32_0 = arith.constant 0 : i32
    return %arg0, %c0_i32 : i32, i32
  }
  func.func @transform_1(%arg0: i32) -> (i32, i32) {
    %c0_i32 = arith.constant 0 : i32
    %c0_i32_0 = arith.constant 0 : i32
    %c0_i32_1 = arith.constant 0 : i32
    return %c0_i32, %c0_i32_0 : i32, i32
  }
  func.func @transform_2(%arg0: i32) -> (i32, i32) {
    %c0_i32 = arith.constant 0 : i32
    %c0_i32_0 = arith.constant 0 : i32
    %c0_i32_1 = arith.constant 0 : i32
    return %c0_i32, %c0_i32_0 : i32, i32
  }
  func.func @transform_3(%arg0: i32) -> (i32, i32) {
    %c0_i32 = arith.constant 0 : i32
    %c0_i32_0 = arith.constant 0 : i32
    %c0_i32_1 = arith.constant 0 : i32
    return %c0_i32, %c0_i32_0 : i32, i32
  }
  func.func @transform_4(%arg0: i32) -> (i32, i32) {
    %c0_i32 = arith.constant 0 : i32
    %c0_i32_0 = arith.constant 0 : i32
    %c0_i32_1 = arith.constant 0 : i32
    return %c0_i32, %c0_i32_0 : i32, i32
  }
  func.func @transform_5(%arg0: i32) -> (i32, i32) {
    %c0_i32 = arith.constant 0 : i32
    %c0_i32_0 = arith.constant 0 : i32
    %c0_i32_1 = arith.constant 0 : i32
    return %c0_i32, %c0_i32_0 : i32, i32
  }
  func.func @transform_6(%arg0: i32) -> (i32, i32) {
    %c0_i32 = arith.constant 0 : i32
    %c0_i32_0 = arith.constant 0 : i32
    %c0_i32_1 = arith.constant 0 : i32
    return %c0_i32, %c0_i32_0 : i32, i32
  }
  func.func @transform_7(%arg0: i32) -> (i32, i32) {
    %c0_i32 = arith.constant 0 : i32
    %c0_i32_0 = arith.constant 0 : i32
    return %arg0, %c0_i32 : i32, i32
  }
}

</mosaic_0001>

<bundles_post_ra>
// kernel: classification2_forward.1
= control target key start
LH: loop header
LB: loop body
LE: loop exit
PB: predicated region body
PF: predicated region fallthrough
CT: control target
= control target key end

     0   :  { %vm50_vm0 = vcmask 261120   ;;  %vm238_vm1 = vcmask 64512   ;;  %s454_s1 = inlined_call_operand.vmem [shape: bf16[32,128], index: 1, kind: input, shape index: {}]   ;;  %s455_s0 = inlined_call_operand.vmem [shape: f32[16,32], index: 0, kind: input, shape index: {}]   ;;  %s456_s3 = inlined_call_operand.vmem [shape: bf16[128,128], index: 3, kind: input, shape index: {}]   ;;  %s457_s2 = inlined_call_operand.vmem [shape: f32[1,128], index: 2, kind: input, shape index: {}]   ;;  %s458_s4 = inlined_call_operand.vmem [shape: f32[1,128], index: 4, kind: input, shape index: {}]   ;;  %s459_s5 = inlined_call_operand.vmem [shape: bf16[128,8], index: 5, kind: input, shape index: {}]   ;;  %s460_s6 = inlined_call_operand.vmem [shape: f32[1,8], index: 6, kind: input, shape index: {}]   ;;  %s461_s7 = inlined_call_operand.vmem [shape: f32[16,8], index: 7, kind: output, shape index: {}]  }
   0x1   :  { %v319_v0 = vld [vmem:[%s454_s1 + $0x8] sm:$0xff]  ;;  %v318_v1 = vld [vmem:[%s454_s1] sm:$0xff]  ;;  %v327_v2 = vld [vmem:[%s456_s3 + $0x38] sm:$0xff] }
   0x2   :  { %60 = vmatpush.bf16.msra.mxu0 %v319_v0  ;;  %v27_v3 = vld [vmem:[%s455_s0] sm:$0xff]  ;;  %v28_v4 = vld [vmem:[%s455_s0 + $0x8] sm:$0xff]  ;;  %139 = vmatpush.bf16.msra.mxu1 %v327_v2  ;;  %v326_v5 = vld [vmem:[%s456_s3 + $0x30] sm:$0xff] }
   0x3   :  { %v29_v6 = vpack.c.bf16 %v28_v4, %v27_v3  ;;  %v325_v7 = vld [vmem:[%s456_s3 + $0x28] sm:$0xff]  ;;  %v324_v8 = vld [vmem:[%s456_s3 + $0x20] sm:$0xff]  ;;  %v323_v9 = vld [vmem:[%s456_s3 + $0x18] sm:$0xff] }
   0x4   :  { %v322_v10 = vld [vmem:[%s456_s3 + $0x10] sm:$0xff]  ;;  %v321_v11 = vld [vmem:[%s456_s3 + $0x8] sm:$0xff]  ;;  %v320_v12 = vld [vmem:[%s456_s3] sm:$0xff] }
   0x5   :  { %v335_v13 = vld [vmem:[%s459_s5 + $0x38] sm:$0xff]  ;;  %v334_v14 = vld [vmem:[%s459_s5 + $0x30] sm:$0xff]  ;;  %v333_v15 = vld [vmem:[%s459_s5 + $0x28] sm:$0xff] }
   0x6   :  { %61 = vmatpush.bf16.msra.mxu0 %v318_v1  ;;  %140 = vmatpush.bf16.msra.mxu1 %v326_v5  ;;  %v332_v16 = vld [vmem:[%s459_s5 + $0x20] sm:$0xff]  ;;  %v331_v25 = vld [vmem:[%s459_s5 + $0x18] sm:$0xff]  ;;  %v330_v26 = vld [vmem:[%s459_s5 + $0x10] sm:$0xff] }
   0x7   :  { %224 = vmatpush.bf16.msra.mxu2 %v335_v13  ;;  %v336_v18 = vld [vmem:[%s457_s2] ss:$0 sm:$0xff]  ;;  %v329_v27 = vld [vmem:[%s459_s5 + $0x8] sm:$0xff] }
   0x8   :  { %v328_v28 = vld [vmem:[%s459_s5] sm:$0xff] }
   0x9   :  { %253 = vmatmul.msk.bf16.vlgmr.msra.gmra.mxu0 %vm50_vm0, %v29_v6  ;;  %v337_v30 = vld [vmem:[%s458_s4] ss:$0 sm:$0xff] }
   0xa   :  { %141 = vmatpush.bf16.msra.mxu1 %v325_v7  ;;  %v338_v37 = vld [vmem:[%s460_s6] ss:$0 sm:$0xff] }
   0xb   :  { %225 = vmatpush.bf16.msra.mxu2 %v334_v14 }
   0xe   :  { %142 = vmatpush.bf16.msra.mxu1 %v324_v8 }
   0xf   :  { %226 = vmatpush.bf16.msra.mxu2 %v333_v15 }
  0x12   :  { %143 = vmatpush.bf16.msra.mxu1 %v323_v9 }
  0x13   :  { %227 = vmatpush.bf16.msra.mxu2 %v332_v16 }
  0x16   :  { %144 = vmatpush.bf16.msra.mxu1 %v322_v10 }
  0x17   :  { %228 = vmatpush.bf16.msra.mxu2 %v331_v25 }
  0x1a   :  { %145 = vmatpush.bf16.msra.mxu1 %v321_v11 }
  0x1b   :  { %229 = vmatpush.bf16.msra.mxu2 %v330_v26 }
  0x1e   :  { %146 = vmatpush.bf16.msra.mxu1 %v320_v12 }
  0x1f   :  { %230 = vmatpush.bf16.msra.mxu2 %v329_v27 }
  0x23   :  { %231 = vmatpush.bf16.msra.mxu2 %v328_v28 }
  0x86   :  { %v63_v17 = vpop.f32.mrf.mxu0 }
  0x87   :  { %v64_v19 = vadd.f32 %v336_v18, %v63_v17 }
  0x89   :  { %v68_v22 = vmax.f32 %v64_v19, 0.0 }
  0x8e   :  { %v65_v20 = vpop.f32.mrf.mxu0 }
  0x8f   :  { %v66_v21 = vadd.f32 %v336_v18, %v65_v20 }
  0x91   :  { %v69_v23 = vmax.f32 %v66_v21, 0.0 }
  0x93   :  { %v70_v24 = vpack.c.bf16 %v69_v23, %v68_v22 }
  0x95   :  { %147 = vmatmul.bf16.vlgmr.msra.gmra.mxu1 %v70_v24 }
 0x112   :  { %v148_v29 = vpop.f32.mrf.mxu1 }
 0x113   :  { %v149_v31 = vadd.f32 %v337_v30, %v148_v29 }
 0x115   :  { %v153_v34 = vmax.f32 %v149_v31, 0.0 }
 0x11a   :  { %v150_v32 = vpop.f32.mrf.mxu1 }
 0x11b   :  { %v151_v33 = vadd.f32 %v337_v30, %v150_v32 }
 0x11d   :  { %v154_v35 = vmax.f32 %v151_v33, 0.0 }
 0x11f   :  { %v155_v36 = vpack.c.bf16 %v154_v35, %v153_v34 }
 0x121   :  { %232 = vmatmul.bf16.vlgmr.msra.gmra.mxu2 %v155_v36 }
 0x1a4   :  { %v233_v38 = vpop.f32.mrf.mxu2 }
 0x1a5   :  { %v234_v39 = vadd.f32 %v338_v37, %v233_v38 }
 0x1a7   :  { %239 = vst.msk [vmem:[%s461_s7] sm:$0xff] %vm238_vm1, %v234_v39 }
 0x1ac   :  { %v235_v40 = vpop.f32.mrf.mxu2 }
 0x1ad   :  { %v236_v41 = vadd.f32 %v338_v37, %v235_v40 }
 0x1af   :  { %240 = vst.msk [vmem:[%s461_s7 + $0x8] sm:$0xff] %vm238_vm1, %v236_v41 }

</bundles_post_ra>
